<compile_context>
chip_gen: v7x
topology: tpu7x:2x2x1
jax: 0.10.0
libtpu: 0.0.40
codegen_flags: <defaults>
</compile_context>

<pallas_src>
import functools

import jax
import jax.numpy as jnp
import numpy as np
from jax.experimental import pallas as pl
from jax.experimental.pallas import tpu as pltpu


def _frequency_layer_kernel(x_ref, filt_ref, beta_ref, w_ref, b_ref, o_ref, *,
                            eps):
    """Fused FrequencyLayer forward for one batch tile.

    x_ref    : (tile_b, seq, hidden) input block (native dtype)
    filt_ref : (seq, seq)   low-pass filter matrix (MXU operand dtype)
    beta_ref : (1, hidden)  sqrt_beta parameter
    w_ref    : (1, hidden)  LayerNorm weight
    b_ref    : (1, hidden)  LayerNorm bias
    o_ref    : (tile_b, seq, hidden) output block
    """
    tile_b, seq, _ = x_ref.shape

    x = x_ref[...]                                            # native dtype
    filt = filt_ref[...]                                      # MXU dtype (no cast)
    beta2 = jnp.square(beta_ref[...].astype(jnp.float32))     # (1, hidden)
    w = w_ref[...].astype(jnp.float32)                        # (1, hidden)
    b = b_ref[...].astype(jnp.float32)                        # (1, hidden)

    # low_pass = irfft(mask * rfft(x)) along seq  ==  filt @ x[b] for every b.
    # One batched MXU contraction over the whole tile, f32 accumulation.
    filt_b = jnp.broadcast_to(filt[None, :, :], (tile_b, seq, seq))
    low = jnp.einsum("bst,bth->bsh", filt_b, x,
                     preferred_element_type=jnp.float32)      # (tb, seq, hid) f32

    xf = x.astype(jnp.float32)
    # low + beta^2*(x - low) + x  ==  x*(1 + beta^2) + low*(1 - beta^2)
    h = xf * (1.0 + beta2) + low * (1.0 - beta2)

    # TF-style LayerNorm over hidden (lane) dim, f32, eps inside sqrt.
    u = jnp.mean(h, axis=-1, keepdims=True)
    hc = h - u
    s = jnp.mean(hc * hc, axis=-1, keepdims=True)
    y = hc * jax.lax.rsqrt(s + eps)

    o_ref[...] = (w * y + b).astype(o_ref.dtype)


@functools.lru_cache(maxsize=None)
def _low_pass_filter(seq_len, c_keep, dtype_name):
    """(seq, seq) matrix of the ortho rfft -> mask -> ortho irfft linear map.

    Built host-side with numpy so it never re-runs on device under jit.
    """
    eye = np.eye(seq_len, dtype=np.float64)
    freq = np.fft.rfft(eye, axis=0, norm="ortho")             # (seq//2+1, seq)
    freq[min(c_keep, freq.shape[0]):, :] = 0.0
    filt = np.fft.irfft(freq, n=seq_len, axis=0, norm="ortho")
    return jnp.asarray(filt, dtype=jnp.dtype(dtype_name))


def _device_vmem_and_cores():
    """(usable VMEM budget in bytes, TensorCores sharing the grid)."""
    try:
        kind = jax.devices()[0].device_kind.lower()
    except Exception:
        kind = ""
    if "v7" in kind:
        return 52 * 2**20, 2            # v7x: 64 MiB physical per TC, 2 TCs
    cores = 2 if ("v4" in kind or "v5p" in kind) else 1       # megacore parts
    return 100 * 2**20, cores           # 128 MiB physical (v5e / v6e / v4 / v5p)


def frequency_layer(x, sqrt_beta, ln_weight, ln_bias, *, c, eps=1e-12):
    """Pallas TPU forward of FrequencyLayer (dropout = identity / eval mode).

    x:         (batch, seq, hidden)
    sqrt_beta: (1, 1, hidden)
    ln_weight, ln_bias: (hidden,)
    """
    batch, seq, hidden = x.shape
    c_keep = c // 2 + 1

    # MXU operand dtype: bf16 inputs stay bf16 (f32 accumulation); else f32.
    mxu_dtype = jnp.bfloat16 if x.dtype == jnp.bfloat16 else jnp.float32
    filt = _low_pass_filter(seq, c_keep, jnp.dtype(mxu_dtype).name)

    beta2d = sqrt_beta.reshape(1, hidden)
    w2 = ln_weight.reshape(1, hidden)
    b2 = ln_bias.reshape(1, hidden)

    vmem_budget, num_cores = _device_vmem_and_cores()

    isize = jnp.dtype(x.dtype).itemsize
    fsize = jnp.dtype(mxu_dtype).itemsize
    # Explicit per-batch-row VMEM accounting:
    #   double-buffered input block + double-buffered output block (x dtype)
    #   ~4 live f32 intermediates (low / h / centered / scaled)
    #   the broadcast filter operand of the batched matmul
    per_row = (4 * seq * hidden * isize
               + 4 * seq * hidden * 4
               + seq * seq * fsize)
    # Filter matrix (double-buffered by the pipeline) + params + headroom.
    fixed = 2 * seq * seq * fsize + 4 * 2**20

    tile_b = max(1, int((vmem_budget - fixed) // per_row))
    tile_b = min(tile_b, batch)
    # Bound a single input DMA block at ~16 MiB (diminishing returns beyond).
    tile_b = min(tile_b, max(1, int((16 * 2**20) // (seq * hidden * isize))))
    if num_cores >= 2 and batch >= 2:
        # Keep >= num_cores grid steps so every TensorCore gets work.
        tile_b = min(tile_b, int(pl.cdiv(batch, num_cores)))
    grid = (int(pl.cdiv(batch, tile_b)),)

    vmem_limit = int(min(vmem_budget, max(32 * 2**20, fixed + tile_b * per_row)))

    kernel = functools.partial(_frequency_layer_kernel, eps=eps)

    return pl.pallas_call(
        kernel,
        out_shape=jax.ShapeDtypeStruct((batch, seq, hidden), x.dtype),
        grid_spec=pltpu.PrefetchScalarGridSpec(
            num_scalar_prefetch=0,
            grid=grid,
            in_specs=[
                pl.BlockSpec((tile_b, seq, hidden), lambda i: (i, 0, 0)),
                pl.BlockSpec((seq, seq), lambda i: (0, 0)),
                pl.BlockSpec((1, hidden), lambda i: (0, 0)),
                pl.BlockSpec((1, hidden), lambda i: (0, 0)),
                pl.BlockSpec((1, hidden), lambda i: (0, 0)),
            ],
            out_specs=pl.BlockSpec((tile_b, seq, hidden), lambda i: (i, 0, 0)),
        ),
        compiler_params=pltpu.CompilerParams(
            dimension_semantics=("parallel",),
            vmem_limit_bytes=vmem_limit,
        ),
    )(x, filt, beta2d, w2, b2)


if __name__ == "__main__":
    key = jax.random.PRNGKey(0)
    k_x, k_beta = jax.random.split(key)

    batch, seq, hidden = 2, 8, 32
    c = 5                      # module hyperparameter -> keeps c//2+1 = 3 rfft bins
    eps = 1e-12

    x = jax.random.normal(k_x, (batch, seq, hidden), dtype=jnp.float32)
    sqrt_beta = jax.random.normal(k_beta, (1, 1, hidden), dtype=jnp.float32)
    ln_weight = jnp.ones((hidden,), dtype=jnp.float32)   # nn.LayerNorm default init
    ln_bias = jnp.zeros((hidden,), dtype=jnp.float32)

    out = frequency_layer(x, sqrt_beta, ln_weight, ln_bias, c=c, eps=eps)
    out = jax.block_until_ready(out)

    # ---- pure-JAX reference (matches the PyTorch forward in eval mode) -----
    c_keep = c // 2 + 1
    xf = jnp.fft.rfft(x, axis=1, norm="ortho")
    keep = (jnp.arange(xf.shape[1]) < c_keep)[None, :, None]
    low = jnp.fft.irfft(xf * keep, n=seq, axis=1, norm="ortho")
    high = x - low
    h = low + sqrt_beta ** 2 * high + x
    u = jnp.mean(h, axis=-1, keepdims=True)
    s = jnp.mean((h - u) ** 2, axis=-1, keepdims=True)
    ref = ln_weight * (h - u) / jnp.sqrt(s + eps) + ln_bias

    assert out.shape == x.shape and out.dtype == x.dtype
    err = float(jnp.max(jnp.abs(out - ref)))
    assert jnp.allclose(out, ref, atol=1e-4, rtol=1e-4), f"max abs err = {err}"

    print("KERNEL_OK")
</pallas_src>

<mosaic_0001>
module attributes {stable_mosaic.version = 11 : i64} {
  func.func @_frequency_layer_kernel(%arg0: i32, %arg1: memref<2x8x32xf32, #tpu.memory_space<vmem>>, %arg2: memref<8x8xf32, #tpu.memory_space<vmem>>, %arg3: memref<1x32xf32, #tpu.memory_space<vmem>>, %arg4: memref<1x32xf32, #tpu.memory_space<vmem>>, %arg5: memref<1x32xf32, #tpu.memory_space<vmem>>, %arg6: memref<2x8x32xf32, #tpu.memory_space<vmem>>) attributes {dimension_semantics = [#tpu.dimension_semantics<parallel>], iteration_bounds = array<i64: 1>, scalar_prefetch = 0 : i64, scratch_operands = 0 : i64, tpu.core_type = #tpu.core_type<tc>, window_params = [{transform_indices = @transform_0, window_bounds = array<i64: 2, 8, 32>}, {pipeline_mode = #tpu.pipeline_mode<synchronous>, transform_indices = @transform_1, window_bounds = array<i64: 8, 8>}, {pipeline_mode = #tpu.pipeline_mode<synchronous>, transform_indices = @transform_2, window_bounds = array<i64: 1, 32>}, {pipeline_mode = #tpu.pipeline_mode<synchronous>, transform_indices = @transform_3, window_bounds = array<i64: 1, 32>}, {pipeline_mode = #tpu.pipeline_mode<synchronous>, transform_indices = @transform_4, window_bounds = array<i64: 1, 32>}, {transform_indices = @transform_5, window_bounds = array<i64: 2, 8, 32>}]} {
    %c0 = arith.constant 0 : index
    %c0_0 = arith.constant 0 : index
    %c0_1 = arith.constant 0 : index
    %0 = vector.load %arg1[%c0, %c0_0, %c0_1] : memref<2x8x32xf32, #tpu.memory_space<vmem>>, vector<2x8x32xf32>
    %c0_2 = arith.constant 0 : index
    %c0_3 = arith.constant 0 : index
    %1 = vector.load %arg2[%c0_2, %c0_3] : memref<8x8xf32, #tpu.memory_space<vmem>>, vector<8x8xf32>
    %c0_4 = arith.constant 0 : index
    %c0_5 = arith.constant 0 : index
    %2 = vector.load %arg3[%c0_4, %c0_5] : memref<1x32xf32, #tpu.memory_space<vmem>>, vector<1x32xf32>
    %3 = arith.mulf %2, %2 : vector<1x32xf32>
    %c0_6 = arith.constant 0 : index
    %c0_7 = arith.constant 0 : index
    %4 = vector.load %arg4[%c0_6, %c0_7] : memref<1x32xf32, #tpu.memory_space<vmem>>, vector<1x32xf32>
    %c0_8 = arith.constant 0 : index
    %c0_9 = arith.constant 0 : index
    %5 = vector.load %arg5[%c0_8, %c0_9] : memref<1x32xf32, #tpu.memory_space<vmem>>, vector<1x32xf32>
    %6 = vector.shape_cast %1 : vector<8x8xf32> to vector<1x8x8xf32>
    %7 = vector.shape_cast %6 : vector<1x8x8xf32> to vector<1x8x8xf32>
    %8 = vector.broadcast %7 : vector<1x8x8xf32> to vector<2x8x8xf32>
    "tpu.trace_start"() <{level = 10 : i32, message = "bst,bth->bsh"}> : () -> ()
    %cst = arith.constant dense<0.000000e+00> : vector<2x8x32xf32>
    %9 = tpu.matmul %8, %0, %cst {dimension_numbers = #tpu.dot_dimension_numbers<[2], [1], [1], [2], [0, 0, 0, 1, 1, 2], [0], [0]>} : vector<2x8x8xf32>, vector<2x8x32xf32>, vector<2x8x32xf32> -> vector<2x8x32xf32>
    "tpu.trace_stop"() : () -> ()
    %cst_10 = arith.constant 1.000000e+00 : f32
    %10 = vector.broadcast %cst_10 : f32 to vector<1x32xf32>
    %11 = arith.addf %10, %3 : vector<1x32xf32>
    %12 = vector.shape_cast %11 : vector<1x32xf32> to vector<1x1x32xf32>
    %13 = vector.broadcast %12 : vector<1x1x32xf32> to vector<2x8x32xf32>
    %14 = arith.mulf %0, %13 : vector<2x8x32xf32>
    %cst_11 = arith.constant 1.000000e+00 : f32
    %15 = vector.broadcast %cst_11 : f32 to vector<1x32xf32>
    %16 = arith.subf %15, %3 : vector<1x32xf32>
    %17 = vector.shape_cast %16 : vector<1x32xf32> to vector<1x1x32xf32>
    %18 = vector.broadcast %17 : vector<1x1x32xf32> to vector<2x8x32xf32>
    %19 = arith.mulf %9, %18 : vector<2x8x32xf32>
    %20 = arith.addf %14, %19 : vector<2x8x32xf32>
    %cst_12 = arith.constant dense<0.000000e+00> : vector<2x8xf32>
    %21 = vector.multi_reduction <add>, %20, %cst_12 [2] : vector<2x8x32xf32> to vector<2x8xf32>
    %22 = vector.shape_cast %21 : vector<2x8xf32> to vector<2x8x1xf32>
    %cst_13 = arith.constant 3.200000e+01 : f32
    %23 = vector.broadcast %cst_13 : f32 to vector<2x8x1xf32>
    %24 = arith.divf %22, %23 : vector<2x8x1xf32>
    %25 = vector.broadcast %24 : vector<2x8x1xf32> to vector<2x8x32xf32>
    %26 = arith.subf %20, %25 : vector<2x8x32xf32>
    %27 = arith.mulf %26, %26 : vector<2x8x32xf32>
    %cst_14 = arith.constant dense<0.000000e+00> : vector<2x8xf32>
    %28 = vector.multi_reduction <add>, %27, %cst_14 [2] : vector<2x8x32xf32> to vector<2x8xf32>
    %29 = vector.shape_cast %28 : vector<2x8xf32> to vector<2x8x1xf32>
    %cst_15 = arith.constant 3.200000e+01 : f32
    %30 = vector.broadcast %cst_15 : f32 to vector<2x8x1xf32>
    %31 = arith.divf %29, %30 : vector<2x8x1xf32>
    %cst_16 = arith.constant 9.99999996E-13 : f32
    %32 = vector.broadcast %cst_16 : f32 to vector<2x8x1xf32>
    %33 = arith.addf %31, %32 : vector<2x8x1xf32>
    %34 = math.rsqrt %33 : vector<2x8x1xf32>
    %35 = vector.broadcast %34 : vector<2x8x1xf32> to vector<2x8x32xf32>
    %36 = arith.mulf %26, %35 : vector<2x8x32xf32>
    %37 = vector.shape_cast %4 : vector<1x32xf32> to vector<1x1x32xf32>
    %38 = vector.broadcast %37 : vector<1x1x32xf32> to vector<2x8x32xf32>
    %39 = arith.mulf %38, %36 : vector<2x8x32xf32>
    %40 = vector.shape_cast %5 : vector<1x32xf32> to vector<1x1x32xf32>
    %41 = vector.broadcast %40 : vector<1x1x32xf32> to vector<2x8x32xf32>
    %42 = arith.addf %39, %41 : vector<2x8x32xf32>
    %c0_17 = arith.constant 0 : index
    %c0_18 = arith.constant 0 : index
    %c0_19 = arith.constant 0 : index
    %43 = vector.load %arg6[%c0_17, %c0_18, %c0_19] : memref<2x8x32xf32, #tpu.memory_space<vmem>>, vector<2x8x32xf32>
    tpu.vector_store %arg6[%c0_17, %c0_18, %c0_19], %42 {strides = array<i32>} : memref<2x8x32xf32, #tpu.memory_space<vmem>>, vector<2x8x32xf32>,
    return
  }
  func.func @transform_0(%arg0: i32) -> (i32, i32, i32) {
    %c0_i32 = arith.constant 0 : i32
    %c0_i32_0 = arith.constant 0 : i32
    %c0_i32_1 = arith.constant 0 : i32
    return %arg0, %c0_i32, %c0_i32_0 : i32, i32, i32
  }
  func.func @transform_1(%arg0: i32) -> (i32, i32) {
    %c0_i32 = arith.constant 0 : i32
    %c0_i32_0 = arith.constant 0 : i32
    %c0_i32_1 = arith.constant 0 : i32
    return %c0_i32, %c0_i32_0 : i32, i32
  }
  func.func @transform_2(%arg0: i32) -> (i32, i32) {
    %c0_i32 = arith.constant 0 : i32
    %c0_i32_0 = arith.constant 0 : i32
    %c0_i32_1 = arith.constant 0 : i32
    return %c0_i32, %c0_i32_0 : i32, i32
  }
  func.func @transform_3(%arg0: i32) -> (i32, i32) {
    %c0_i32 = arith.constant 0 : i32
    %c0_i32_0 = arith.constant 0 : i32
    %c0_i32_1 = arith.constant 0 : i32
    return %c0_i32, %c0_i32_0 : i32, i32
  }
  func.func @transform_4(%arg0: i32) -> (i32, i32) {
    %c0_i32 = arith.constant 0 : i32
    %c0_i32_0 = arith.constant 0 : i32
    %c0_i32_1 = arith.constant 0 : i32
    return %c0_i32, %c0_i32_0 : i32, i32
  }
  func.func @transform_5(%arg0: i32) -> (i32, i32, i32) {
    %c0_i32 = arith.constant 0 : i32
    %c0_i32_0 = arith.constant 0 : i32
    %c0_i32_1 = arith.constant 0 : i32
    return %arg0, %c0_i32, %c0_i32_0 : i32, i32, i32
  }
}

</mosaic_0001>

<bundles_post_ra>
// kernel: tpu_custom_call.1
= control target key start
LH: loop header
LB: loop body
LE: loop exit
PB: predicated region body
PF: predicated region fallthrough
CT: control target
= control target key end

     0   :  { %10 = vsyncpa [#allocation3], 0  ;;  %s477_s0 = inlined_call_operand.hbm [shape: f32[2,8,32], index: 0, kind: input, shape index: {}]   ;;  %s478_s1 = inlined_call_operand.hbm [shape: f32[8,8], index: 1, kind: input, shape index: {}]   ;;  %s479_s2 = inlined_call_operand.vmem [shape: f32[1,32], index: 2, kind: input, shape index: {}]   ;;  %s480_s3 = inlined_call_operand.vmem [shape: f32[1,32], index: 3, kind: input, shape index: {}]   ;;  %s481_s4 = inlined_call_operand.vmem [shape: f32[1,32], index: 4, kind: input, shape index: {}]   ;;  %s482_s5 = inlined_call_operand.hbm [shape: f32[2,8,32], index: 5, kind: output, shape index: {}]  }
   0x1   :  { %11 = vsyncpa [#allocation6], 0 }
   0x2   :  { %12 = vsyncpa [#allocation4], 0  ;;  %s383_s18 = smov [#allocation2]   ;;  %s311_s22 = scalar_lea.hbm %s477_s0, 256 }
   0x3   :  { %s18_s19 = sshll.u32 %s383_s18, 4  ;;  %p312_p0 = scmp.ne.s32.totalorder %s477_s0, %s311_s22  ;;  %s19_s19 = int_to_ptr.vmem [resolvable:$true] %s18_s19 }
   0x4   :  { %p315_p1 = scmp.lt.u32.totalorder %s311_s22, %s477_s0 }
   0x6   :  { %p317_p2 = pnand %p315_p1, %p312_p0 }
   0x8   :  { %320 = shalt.err (!%p317_p2)
}
   0x9   :  { %s321_s27 = scalar_lea.vmem %s19_s19, 256  ;;  %p326_p4 = scmp.lt.s32.totalorder %s19_s19, %s19_s19 }
   0xa   :  { %p322_p3 = scmp.ne.s32.totalorder %s19_s19, %s321_s27  ;;  %p327_p5 = scmp.lt.s32.totalorder %s321_s27, %s321_s27 }
   0xc   :  { %p328_p6 = por %p327_p5, %p326_p4 }
   0xe   :  { %p329_p7 = pnand %p328_p6, %p322_p3 }
  0x10   :  { %332 = shalt.err (!%p329_p7)
}
  0x11   :  { %s384_s28 = smov 128   ;;  %s385_s29 = smov 8  }
  0x12   :  { %24 = dma.hbm_to_vmem [thread:$0]  %s477_s0, 256, %s19_s19, [#allocation3], %s384_s28, %s384_s28, %s385_s29  }
  0x13   :  { %s386_s7 = smov [#allocation5]   ;;  %s333_s11 = scalar_lea.hbm %s478_s1, 128 }
  0x14   :  { %s31_s8 = sshll.u32 %s386_s7, 4  ;;  %p334_p8 = scmp.ne.s32.totalorder %s478_s1, %s333_s11  ;;  %s32_s8 = int_to_ptr.vmem [resolvable:$true] %s31_s8 }
  0x15   :  { %p337_p9 = scmp.lt.u32.totalorder %s333_s11, %s478_s1 }
  0x17   :  { %p339_p10 = pnand %p337_p9, %p334_p8 }
  0x19   :  { %342 = shalt.err (!%p339_p10)
}
  0x1a   :  { %s343_s16 = scalar_lea.vmem %s32_s8, 128  ;;  %p348_p12 = scmp.lt.s32.totalorder %s32_s8, %s32_s8 }
  0x1b   :  { %p344_p11 = scmp.ne.s32.totalorder %s32_s8, %s343_s16  ;;  %p349_p13 = scmp.lt.s32.totalorder %s343_s16, %s343_s16 }
  0x1d   :  { %p350_p0 = por %p349_p13, %p348_p12 }
  0x1f   :  { %p351_p1 = pnand %p350_p0, %p344_p11 }
  0x21   :  { %354 = shalt.err (!%p351_p1)
}
  0x22   :  { %34 = dma.hbm_to_vmem [thread:$0]  %s478_s1, 128, %s32_s8, [#allocation6]  }
  0x23   :  { %377 = dma.done.wait [#allocation3], 256  }
  0x24   :  { %378 = vsyncadd [#allocation3], 4294967040 }
  0x25   :  { %379 = dma.done.wait [#allocation6], 128  }
  0x26   :  { %380 = vsyncadd [#allocation6], 4294967168  ;;  %v387_v0 = vmov 0.0   ;;  %vm388_vm0 = vmmov 0   ;;  %vm54_vm1 = vcmask 64512   ;;  %v47_v1 = vld [vmem:[#allocation2] sm:$0xff]  ;;  %v200_v4 = vlaneseq }
  0x27   :  { %290 = vmatprep.subr.mxu0 %v387_v0  ;;  %292 = vmatprep.mubr.msk.f32.mxu0 %vm388_vm0, %v387_v0  ;;  %v49_v2 = vld [vmem:[#allocation5] sm:$0xff]  ;;  %v48_v3 = vld [vmem:[#allocation2 + $0x8] sm:$0xff]  ;;  %v50_v5 = vld [vmem:[%s479_s2] sm:$0x1]  ;;  %vm218_vm2 = vcmask 261120   ;;  %s389_s22 = smov [#allocation7]  }
  0x28   :  { %295 = vmatprep.subr.mxu1 %v387_v0  ;;  %297 = vmatprep.mubr.msk.f32.mxu1 %vm388_vm0, %v387_v0  ;;  %v51_v6 = vmul.f32 %v50_v5, %v50_v5  ;;  %v201_v7 = vshrl.u32 %v200_v4, 7  ;;  %v284_v42 = vld [vmem:[%s480_s3] ss:$0 sm:$0xff]  ;;  %s269_s23 = sshll.u32 %s389_s22, 4  ;;  %s270_s23 = int_to_ptr.vmem [resolvable:$true] %s269_s23 }
  0x29   :  { %291 = vmatpush3.msra.mxu0 %v47_v1  ;;  %296 = vmatpush3.msra.mxu1 %v48_v3  ;;  %v285_v44 = vld [vmem:[%s481_s4] ss:$0 sm:$0xff]  ;;  %s355_s24 = scalar_lea.vmem %s270_s23, 256  ;;  %p360_p3 = scmp.lt.s32.totalorder %s270_s23, %s270_s23 }
  0x2a   :  { %293 = vmatmul.mubr.msk.f32.vlgmr.msra.gmra.mrb[0].mxu0 %vm54_vm1, %v49_v2  ;;  %298 = vmatmul.mubr.msk.f32.vlgmr.msra.gmra.mrb[0].mxu1 %vm54_vm1, %v49_v2  ;;  %v198_v8 = vadd.f32 1.0, %v51_v6  ;;  %v202_v9 = vsub.s32 0, %v201_v7  ;;  %v207_v10 = vsub.f32 1.0, %v51_v6  ;;  %p356_p2 = scmp.ne.s32.totalorder %s270_s23, %s355_s24  ;;  %p361_p4 = scmp.lt.s32.totalorder %s355_s24, %s355_s24 }
  0x2c   :  { %v203_v11 = vrot.slane %v198_v8, %v202_v9  ;;  %v212_v12 = vrot.slane %v207_v10, %v202_v9  ;;  %p362_p5 = por %p361_p4, %p360_p3 }
  0x2e   :  { %v205_v13 = vmul.f32 %v203_v11, %v47_v1  ;;  %v206_v14 = vmul.f32 %v203_v11, %v48_v3  ;;  %p363_p6 = pnand %p362_p5, %p356_p2 }
  0xfd   :  { %v124_v15 = vpop.f32.mrb[0].mxu0  ;;  %v194_v18 = vpop.f32.mrb[0].mxu1 }
  0xfe   :  { %v214_v16 = vmul.f32 %v212_v12, %v124_v15  ;;  %v294_v17 = vpop.f32.mrb[1].mxu0  ;;  %v215_v19 = vmul.f32 %v212_v12, %v194_v18  ;;  %v299_v20 = vpop.f32.mrb[1].mxu1 }
 0x100   :  { %v216_v21 = vadd.f32 %v214_v16, %v205_v13  ;;  %v217_v22 = vadd.f32 %v215_v19, %v206_v14 }
 0x102   :  { %v219_v23 = vsel %vm218_vm2, %v216_v21, 0.0  ;;  %v222_v24 = vsel %vm218_vm2, %v217_v22, 0.0 }
 0x103   :  { %220 = vadd.xlane.f32.xlu0 %v219_v23 }
 0x107   :  { %223 = vadd.xlane.f32.xlu0 %v222_v24 }
 0x190   :  { %v221_v25 = vpop.xlane.xlu0 %220 }
 0x191   :  { %v226_v26 = vmul.f32 0.03125, %v221_v25 }
 0x193   :  { %v228_v27 = vsub.f32 %v216_v21, %v226_v26 }
 0x194   :  { %v224_v28 = vpop.xlane.xlu0 %223 }
 0x195   :  { %v227_v29 = vmul.f32 0.03125, %v224_v28  ;;  %v230_v30 = vmul.f32 %v228_v27, %v228_v27 }
 0x197   :  { %v229_v31 = vsub.f32 %v217_v22, %v227_v29  ;;  %v232_v32 = vsel %vm218_vm2, %v230_v30, 0.0 }
 0x198   :  { %233 = vadd.xlane.f32.xlu1 %v232_v32 }
 0x199   :  { %v231_v33 = vmul.f32 %v229_v31, %v229_v31 }
 0x19b   :  { %v235_v34 = vsel %vm218_vm2, %v231_v33, 0.0 }
 0x19c   :  { %236 = vadd.xlane.f32.xlu1 %v235_v34 }
 0x225   :  { %v234_v35 = vpop.xlane.xlu1 %233 }
 0x226   :  { %v238_v36 = vmul.f32 0.03125, %v234_v35 }
 0x228   :  { %v240_v37 = vadd.f32 1e-12, %v238_v36 }
 0x229   :  { %v237_v38 = vpop.xlane.xlu1 %236 }
 0x22a   :  { %307 = vrsqrt.f32 %v240_v37  ;;  %v239_v39 = vmul.f32 0.03125, %v237_v38 }
 0x22c   :  { %v241_v40 = vadd.f32 1e-12, %v239_v39 }
 0x22e   :  { %309 = vrsqrt.f32 %v241_v40 }
 0x234   :  { %v308_v41 = vpop.eup %307 }
 0x235   :  { %v244_v43 = vmul.f32 %v308_v41, %v228_v27 }
 0x237   :  { %v252_v45 = vmul.f32 %v284_v42, %v244_v43 }
 0x238   :  { %v310_v46 = vpop.eup %309 }
 0x239   :  { %v245_v47 = vmul.f32 %v310_v46, %v229_v31  ;;  %v260_v48 = vadd.f32 %v285_v44, %v252_v45 }
 0x23b   :  { %v253_v49 = vmul.f32 %v284_v42, %v245_v47  ;;  %262 = vst.msk [vmem:[#allocation7] sm:$0xff] %vm218_vm2, %v260_v48 }
 0x23d   :  { %v261_v50 = vadd.f32 %v285_v44, %v253_v49 }
 0x23f   :  { %263 = vst.msk [vmem:[#allocation7 + $0x8] sm:$0xff] %vm218_vm2, %v261_v50 }
 0x240   :  { %366 = shalt.err (!%p363_p6)
}
 0x241   :  { %s367_s25 = scalar_lea.hbm %s482_s5, 256 }
 0x242   :  { %p368_p7 = scmp.ne.s32.totalorder %s482_s5, %s367_s25  ;;  %p371_p8 = scmp.lt.u32.totalorder %s367_s25, %s482_s5 }
 0x244   :  { %p373_p9 = pnand %p371_p8, %p368_p7 }
 0x246   :  { %376 = shalt.err (!%p373_p9)
}
 0x247   :  { %275 = dma.vmem_to_hbm [thread:$0]  %s270_s23, 256, %s482_s5, [#allocation4], %s384_s28, %s384_s28, %s385_s29  }
 0x248   :  { %381 = dma.done.wait [#allocation4], 256  }
 0x249   :  { %382 = vsyncadd [#allocation4], 4294967040 }
 0x24a   :  { %279 = vsyncpa [#allocation3], 1 }
 0x24b   :  { %280 = vsyncpa [#allocation6], 1 }
 0x24c   :  { %281 = vsyncpa [#allocation4], 1 }

</bundles_post_ra>
